<compile_context>
chip_gen: v7x
topology: tpu7x:2x2x1
jax: 0.10.0
libtpu: 0.0.40
codegen_flags: <defaults>
</compile_context>

<pallas_src>
import jax
import jax.numpy as jnp
from jax.experimental import pallas as pl
from jax.experimental.pallas import tpu as pltpu


def _round_up(x, m):
    return (x + m - 1) // m * m


def _pick_batch_tile(B):
    B8 = _round_up(B, 8)
    if B8 <= 8:
        return B8                      # too small to split; one fat step
    # Aim for >=2 grid steps (feeds both v7x TensorCores); cap the tile so the
    # (TB, S, Vt) one-hot intermediate stays comfortably in VMEM/vregs.
    return min(256, _round_up((B8 + 1) // 2, 8))


def triplet_embed_kernel(ids_ref, invcnt_ref, tw_ref, b_ref, o_ref, acc_ref):
    # ids_ref:    (TB, S, 1)  int32 pre-masked token ids (padding == -1)
    # invcnt_ref: (TB, 1)     f32 1 / max(mask.sum, 1)
    # tw_ref:     (VT, Hp)    f32 fused embedding@W chunk (vocab rows vi*VT..)
    # b_ref:      (1, Hp)     f32 projection bias (zero-padded to 128 lanes)
    # o_ref:      (TB, Hp)    f32 L2-normalized pooled embeddings
    # acc_ref:    (TB, Hp)    f32 VMEM accumulator (resident across vocab axis)
    vi = pl.program_id(1)

    @pl.when(vi == 0)
    def _():
        acc_ref[...] = jnp.zeros_like(acc_ref)

    ids = ids_ref[...]                                        # (TB, S, 1)
    tb, s, _ = ids.shape
    vt = tw_ref.shape[0]

    # Shift ids into this vocab chunk's local range (scalar math on the small
    # (TB,S,1) tensor, not the big iota) and build the one-hot histogram.
    # Pre-masked ids (-1) and out-of-chunk ids never match [0, VT).
    ids_local = ids - vi * vt                                 # (TB, S, 1)
    iota_v = jax.lax.broadcasted_iota(jnp.int32, (tb, s, vt), 2)
    onehot = (ids_local == iota_v).astype(jnp.float32)        # (TB, S, VT)
    hist = jnp.sum(onehot, axis=1)                            # (TB, VT)

    # Fold the masked-mean scale into the smallest tensor on this path.
    hist = hist * invcnt_ref[...]                             # (TB, VT)

    # Masked mean of embeddings, already projected: hist @ (table @ W).
    acc_ref[...] += jnp.dot(hist.astype(tw_ref.dtype), tw_ref[...],
                            preferred_element_type=jnp.float32)  # (TB, Hp)

    @pl.when(vi == pl.num_programs(1) - 1)
    def _():
        pooled = acc_ref[...] + b_ref[...]                    # bias averages to itself
        # F.normalize(p=2, dim=1): x / max(||x||, 1e-12) via EUP rsqrt on the
        # clamped squared norm; padded lanes are exactly zero.
        sq = jnp.sum(pooled * pooled, axis=1, keepdims=True)  # (TB, 1)
        inv_norm = jax.lax.rsqrt(jnp.maximum(sq, 1e-24))
        o_ref[...] = pooled * inv_norm


def triplet_embedding_forward(input_ids, attention_mask, embedding_table, w, b,
                              *, batch_tile=None, vocab_tile=None,
                              mxu_bf16=False):
    """input_ids/attention_mask: (B, S). Returns (B, H) f32, rows L2-normalized."""
    B, S = input_ids.shape
    V, E = embedding_table.shape
    H = w.shape[1]

    # Lane-dense output: pad H to a multiple of 128 with zero W columns / bias.
    H_pad = _round_up(H, 128)

    # Fuse the two matmuls once in the wrapper (exact by linearity):
    #   mean(emb[ids]) @ W == (hist/count) @ (table @ W)
    w_p = jnp.pad(w.astype(jnp.float32), ((0, 0), (0, H_pad - H)))
    table_w = jnp.dot(embedding_table.astype(jnp.float32), w_p)   # (V, H_pad)
    b_p = jnp.pad(b.astype(jnp.float32).reshape(1, H), ((0, 0), (0, H_pad - H)))

    # Tile sizes.
    if batch_tile is None:
        batch_tile = _pick_batch_tile(B)
    TB = batch_tile
    B_pad = _round_up(B, TB)

    if vocab_tile is None:
        vocab_tile = min(_round_up(V, 128), 512)
    VT = vocab_tile
    V_pad = _round_up(V, VT)

    # Pre-mask ids so padded tokens (-1) never match any vocab row; the mask
    # itself never enters the kernel.  Count comes from the mask (faithful to
    # PyTorch's division by attention_mask.sum()); clamp avoids NaN on
    # all-padding rows (only the batch-padding rows here).
    mask = attention_mask.astype(jnp.float32)
    ids_masked = jnp.where(mask > 0, input_ids.astype(jnp.int32), -1)
    ids3 = ids_masked.reshape(B, S, 1)
    inv_count = (1.0 / jnp.maximum(mask.sum(axis=1), 1.0)).reshape(B, 1)

    if B_pad != B:
        ids3 = jnp.pad(ids3, ((0, B_pad - B), (0, 0), (0, 0)),
                       constant_values=-1)
        inv_count = jnp.pad(inv_count, ((0, B_pad - B), (0, 0)),
                            constant_values=1.0)
    if V_pad != V:
        table_w = jnp.pad(table_w, ((0, V_pad - V), (0, 0)))

    if mxu_bf16:
        # v6e/v7x production lever: bf16 MXU operands (tolerance ~1e-3).
        table_w = table_w.astype(jnp.bfloat16)

    grid = (B_pad // TB, V_pad // VT)

    out = pl.pallas_call(
        triplet_embed_kernel,
        out_shape=jax.ShapeDtypeStruct((B_pad, H_pad), jnp.float32),
        grid_spec=pltpu.PrefetchScalarGridSpec(
            num_scalar_prefetch=0,
            grid=grid,
            in_specs=[
                pl.BlockSpec((TB, S, 1), lambda bi, vi: (bi, 0, 0)),    # ids
                pl.BlockSpec((TB, 1), lambda bi, vi: (bi, 0)),          # 1/count
                pl.BlockSpec((VT, H_pad), lambda bi, vi: (vi, 0)),      # table@W chunk
                pl.BlockSpec((1, H_pad), lambda bi, vi: (0, 0)),        # bias
            ],
            out_specs=pl.BlockSpec((TB, H_pad), lambda bi, vi: (bi, 0)),
            scratch_shapes=[pltpu.VMEM((TB, H_pad), jnp.float32)],
        ),
        compiler_params=pltpu.CompilerParams(
            dimension_semantics=("parallel", "arbitrary")),
    )(ids3, inv_count, table_w, b_p)

    return out[:B, :H]


def reference_forward(input_ids, attention_mask, embedding_table, w, b):
    """Pure-JAX reference matching the PyTorch semantics."""
    x_emb = embedding_table[input_ids]                      # (B, S, E)
    hidden = jnp.einsum("bse,eh->bsh", x_emb, w) + b        # (B, S, H)
    mask = attention_mask.astype(jnp.float32)               # (B, S)
    masked = jnp.where(mask[..., None] > 0, hidden, 0.0)
    pooled = masked.sum(axis=1) / mask.sum(axis=1)[..., None]
    norm = jnp.maximum(jnp.linalg.norm(pooled, axis=1, keepdims=True), 1e-12)
    return pooled / norm


if __name__ == "__main__":
    B, S, E, H, V = 2, 8, 32, 32, 64

    key = jax.random.PRNGKey(0)
    k_emb, k_w, k_b, k_ids = jax.random.split(key, 4)

    # Deterministic synthetic "base model" parameters (no checkpoint loading).
    # TODO(synk): the spec's base_model is an arbitrary transformer; it is
    # synthesized here as embedding-lookup + linear projection.
    embedding_table = jax.random.normal(k_emb, (V, E), dtype=jnp.float32) * 0.1
    w = jax.random.normal(k_w, (E, H), dtype=jnp.float32) * 0.1
    b = jax.random.normal(k_b, (H,), dtype=jnp.float32) * 0.1

    input_ids = jax.random.randint(k_ids, (B, S), 0, V, dtype=jnp.int32)
    # Variable-length attention mask (1s then 0s), like padded sequences.
    lengths = jnp.array([6, 8], dtype=jnp.int32)
    attention_mask = (jnp.arange(S)[None, :] < lengths[:, None]).astype(jnp.int32)

    out = triplet_embedding_forward(input_ids, attention_mask,
                                    embedding_table, w, b)
    out = jax.block_until_ready(out)

    ref = reference_forward(input_ids, attention_mask, embedding_table, w, b)

    assert out.shape == (B, H)
    assert jnp.allclose(out, ref, atol=1e-5, rtol=1e-5), "mismatch vs reference"
    # Norms should be ~1.0 after F.normalize.
    assert jnp.allclose(jnp.linalg.norm(out, axis=1), 1.0, atol=1e-5)

    print("KERNEL_OK")
</pallas_src>

<mosaic_0001>
module attributes {stable_mosaic.version = 11 : i64} {
  func.func @triplet_embed_kernel(%arg0: i32, %arg1: i32, %arg2: memref<8x8x1xi32, #tpu.memory_space<vmem>>, %arg3: memref<8x1xf32, #tpu.memory_space<vmem>>, %arg4: memref<128x128xf32, #tpu.memory_space<vmem>>, %arg5: memref<1x128xf32, #tpu.memory_space<vmem>>, %arg6: memref<8x128xf32, #tpu.memory_space<vmem>>, %arg7: memref<8x128xf32, #tpu.memory_space<vmem>>) attributes {dimension_semantics = [#tpu.dimension_semantics<parallel>, #tpu.dimension_semantics<arbitrary>], iteration_bounds = array<i64: 1, 1>, scalar_prefetch = 0 : i64, scratch_operands = 1 : i64, tpu.core_type = #tpu.core_type<tc>, window_params = [{transform_indices = @transform_0, window_bounds = array<i64: 8, 8, 1>}, {transform_indices = @transform_1, window_bounds = array<i64: 8, 1>}, {transform_indices = @transform_2, window_bounds = array<i64: 128, 128>}, {pipeline_mode = #tpu.pipeline_mode<synchronous>, transform_indices = @transform_3, window_bounds = array<i64: 1, 128>}, {transform_indices = @transform_4, window_bounds = array<i64: 8, 128>}]} {
    %c0_i32 = arith.constant 0 : i32
    %0 = arith.cmpi eq, %arg1, %c0_i32 : i32
    %1 = arith.extui %0 : i1 to i32
    %c0_i32_0 = arith.constant 0 : i32
    %2 = arith.cmpi ne, %1, %c0_i32_0 : i32
    scf.if %2 {
      %cst_14 = arith.constant 0.000000e+00 : f32
      %24 = vector.broadcast %cst_14 : f32 to vector<8x128xf32>
      %c0_15 = arith.constant 0 : index
      %c0_16 = arith.constant 0 : index
      %25 = vector.load %arg7[%c0_15, %c0_16] : memref<8x128xf32, #tpu.memory_space<vmem>>, vector<8x128xf32>
      tpu.vector_store %arg7[%c0_15, %c0_16], %24 {strides = array<i32>} : memref<8x128xf32, #tpu.memory_space<vmem>>, vector<8x128xf32>,
    } else {
    }
    %c0 = arith.constant 0 : index
    %c0_1 = arith.constant 0 : index
    %c0_2 = arith.constant 0 : index
    %3 = vector.load %arg2[%c0, %c0_1, %c0_2] : memref<8x8x1xi32, #tpu.memory_space<vmem>>, vector<8x8x1xi32>
    %c128_i32 = arith.constant 128 : i32
    %4 = arith.muli %arg1, %c128_i32 : i32
    %5 = vector.broadcast %4 : i32 to vector<8x8x1xi32>
    %6 = arith.subi %3, %5 : vector<8x8x1xi32>
    %7 = tpu.iota {dimensions = array<i32: 2>} : vector<8x8x128xi32>
    %8 = vector.broadcast %6 : vector<8x8x1xi32> to vector<8x8x128xi32>
    %9 = arith.cmpi eq, %8, %7 : vector<8x8x128xi32>
    %10 = arith.extui %9 : vector<8x8x128xi1> to vector<8x8x128xi32>
    %11 = arith.sitofp %10 : vector<8x8x128xi32> to vector<8x8x128xf32>
    %cst = arith.constant dense<0.000000e+00> : vector<8x128xf32>
    %12 = vector.multi_reduction <add>, %11, %cst [1] : vector<8x8x128xf32> to vector<8x128xf32>
    %c0_3 = arith.constant 0 : index
    %c0_4 = arith.constant 0 : index
    %13 = vector.load %arg3[%c0_3, %c0_4] : memref<8x1xf32, #tpu.memory_space<vmem>>, vector<8x1xf32>
    %14 = vector.broadcast %13 : vector<8x1xf32> to vector<8x128xf32>
    %15 = arith.mulf %12, %14 : vector<8x128xf32>
    %c0_5 = arith.constant 0 : index
    %c0_6 = arith.constant 0 : index
    %16 = vector.load %arg7[%c0_5, %c0_6] : memref<8x128xf32, #tpu.memory_space<vmem>>, vector<8x128xf32>
    %c0_7 = arith.constant 0 : index
    %c0_8 = arith.constant 0 : index
    %17 = vector.load %arg4[%c0_7, %c0_8] : memref<128x128xf32, #tpu.memory_space<vmem>>, vector<128x128xf32>
    %cst_9 = arith.constant dense<0.000000e+00> : vector<8x128xf32>
    %18 = tpu.matmul %15, %17, %cst_9 {dimension_numbers = #tpu.dot_dimension_numbers<[1], [0], [0], [1], [0, 0, 1, 1], [], []>} : vector<8x128xf32>, vector<128x128xf32>, vector<8x128xf32> -> vector<8x128xf32>
    %19 = arith.addf %16, %18 : vector<8x128xf32>
    %c0_10 = arith.constant 0 : index
    %c0_11 = arith.constant 0 : index
    %20 = vector.load %arg7[%c0_10, %c0_11] : memref<8x128xf32, #tpu.memory_space<vmem>>, vector<8x128xf32>
    tpu.vector_store %arg7[%c0_10, %c0_11], %19 {strides = array<i32>} : memref<8x128xf32, #tpu.memory_space<vmem>>, vector<8x128xf32>,
    %c0_i32_12 = arith.constant 0 : i32
    %21 = arith.cmpi eq, %arg1, %c0_i32_12 : i32
    %22 = arith.extui %21 : i1 to i32
    %c0_i32_13 = arith.constant 0 : i32
    %23 = arith.cmpi ne, %22, %c0_i32_13 : i32
    scf.if %23 {
      %c0_14 = arith.constant 0 : index
      %c0_15 = arith.constant 0 : index
      %24 = vector.load %arg7[%c0_14, %c0_15] : memref<8x128xf32, #tpu.memory_space<vmem>>, vector<8x128xf32>
      %c0_16 = arith.constant 0 : index
      %c0_17 = arith.constant 0 : index
      %25 = vector.load %arg5[%c0_16, %c0_17] : memref<1x128xf32, #tpu.memory_space<vmem>>, vector<1x128xf32>
      %26 = vector.broadcast %25 : vector<1x128xf32> to vector<8x128xf32>
      %27 = arith.addf %24, %26 : vector<8x128xf32>
      %28 = arith.mulf %27, %27 : vector<8x128xf32>
      %cst_18 = arith.constant dense<0.000000e+00> : vector<8xf32>
      %29 = vector.multi_reduction <add>, %28, %cst_18 [1] : vector<8x128xf32> to vector<8xf32>
      %30 = vector.shape_cast %29 : vector<8xf32> to vector<8x1xf32>
      %cst_19 = arith.constant 1.000000e-24 : f32
      %31 = vector.broadcast %cst_19 : f32 to vector<8x1xf32>
      %32 = arith.maximumf %30, %31 : vector<8x1xf32>
      %33 = math.rsqrt %32 : vector<8x1xf32>
      %34 = vector.broadcast %33 : vector<8x1xf32> to vector<8x128xf32>
      %35 = arith.mulf %27, %34 : vector<8x128xf32>
      %c0_20 = arith.constant 0 : index
      %c0_21 = arith.constant 0 : index
      %36 = vector.load %arg6[%c0_20, %c0_21] : memref<8x128xf32, #tpu.memory_space<vmem>>, vector<8x128xf32>
      tpu.vector_store %arg6[%c0_20, %c0_21], %35 {strides = array<i32>} : memref<8x128xf32, #tpu.memory_space<vmem>>, vector<8x128xf32>,
    } else {
    }
    return
  }
  func.func @transform_0(%arg0: i32, %arg1: i32) -> (i32, i32, i32) {
    %c0_i32 = arith.constant 0 : i32
    %c0_i32_0 = arith.constant 0 : i32
    %c0_i32_1 = arith.constant 0 : i32
    return %arg0, %c0_i32, %c0_i32_0 : i32, i32, i32
  }
  func.func @transform_1(%arg0: i32, %arg1: i32) -> (i32, i32) {
    %c0_i32 = arith.constant 0 : i32
    %c0_i32_0 = arith.constant 0 : i32
    return %arg0, %c0_i32 : i32, i32
  }
  func.func @transform_2(%arg0: i32, %arg1: i32) -> (i32, i32) {
    %c0_i32 = arith.constant 0 : i32
    %c0_i32_0 = arith.constant 0 : i32
    return %arg1, %c0_i32 : i32, i32
  }
  func.func @transform_3(%arg0: i32, %arg1: i32) -> (i32, i32) {
    %c0_i32 = arith.constant 0 : i32
    %c0_i32_0 = arith.constant 0 : i32
    %c0_i32_1 = arith.constant 0 : i32
    return %c0_i32, %c0_i32_0 : i32, i32
  }
  func.func @transform_4(%arg0: i32, %arg1: i32) -> (i32, i32) {
    %c0_i32 = arith.constant 0 : i32
    %c0_i32_0 = arith.constant 0 : i32
    return %arg0, %c0_i32 : i32, i32
  }
}

</mosaic_0001>

<bundles_post_ra>
// kernel: tpu_custom_call.1
= control target key start
LH: loop header
LB: loop body
LE: loop exit
PB: predicated region body
PF: predicated region fallthrough
CT: control target
= control target key end

     0   :  { %9 = vsyncpa [#allocation4], 0  ;;  %s569_s0 = inlined_call_operand.vmem [shape: s32[8,8,1], index: 0, kind: input, shape index: {}]   ;;  %s570_s1 = inlined_call_operand.vmem [shape: f32[8,1], index: 1, kind: input, shape index: {}]   ;;  %s571_s2 = inlined_call_operand.hbm [shape: f32[128,128], index: 2, kind: input, shape index: {}]   ;;  %s572_s3 = inlined_call_operand.vmem [shape: f32[1,128], index: 3, kind: input, shape index: {}]   ;;  %s573_s4 = inlined_call_operand.hbm [shape: f32[8,128], index: 4, kind: output, shape index: {}]  }
   0x1   :  { %10 = vsyncpa [#allocation5], 0  ;;  %s479_s15 = smov [#allocation3]   ;;  %s431_s19 = scalar_lea.hbm %s571_s2, 2048 }
   0x2   :  { %s20_s16 = sshll.u32 %s479_s15, 4  ;;  %p432_p0 = scmp.ne.s32.totalorder %s571_s2, %s431_s19  ;;  %s21_s16 = int_to_ptr.vmem [resolvable:$true] %s20_s16 }
   0x3   :  { %p435_p1 = scmp.lt.u32.totalorder %s431_s19, %s571_s2 }
   0x5   :  { %p437_p2 = pnand %p435_p1, %p432_p0 }
   0x7   :  { %440 = shalt.err (!%p437_p2)
}
   0x8   :  { %s441_s24 = scalar_lea.vmem %s21_s16, 2048  ;;  %p446_p4 = scmp.lt.s32.totalorder %s21_s16, %s21_s16 }
   0x9   :  { %p442_p3 = scmp.ne.s32.totalorder %s21_s16, %s441_s24  ;;  %p447_p5 = scmp.lt.s32.totalorder %s441_s24, %s441_s24 }
   0xb   :  { %p448_p6 = por %p447_p5, %p446_p4 }
   0xd   :  { %p449_p7 = pnand %p448_p6, %p442_p3 }
   0xf   :  { %452 = shalt.err (!%p449_p7)
}
  0x10   :  { %s480_s25 = smov 128   ;;  %s481_s26 = smov 8  }
  0x11   :  { %26 = dma.hbm_to_vmem [thread:$0]  %s571_s2, 2048, %s21_s16, [#allocation4], %s480_s25, %s480_s25, %s481_s26  }
  0x12   :  { %475 = dma.done.wait [#allocation4], 2048  }
  0x13   :  { %476 = vsyncadd [#allocation4], 4294965248  ;;  %v482_v0 = vmov 0   ;;  %v38_v1 = vld [vmem:[%s569_s0 + $0x8] sm:$0xff]  ;;  %v37_v2 = vld [vmem:[%s569_s0] sm:$0xff]  ;;  %v483_v5 = vmov 0.0|0.0   ;;  %v55_v36 = vlaneseq }
  0x14   :  { %428 = vset.pattern.permute.xlu1 %v482_v0  ;;  %427 = vset.pattern.permute.xlu0 %v482_v0  ;;  %v39_v3 = vld [vmem:[%s569_s0 + $0x10] sm:$0xff]  ;;  %v40_v4 = vld [vmem:[%s569_s0 + $0x18] sm:$0xff]  ;;  %v182_v6 = vld [vmem:[#allocation3] sm:$0xff]  ;;  %vm484_vm0 = vmmov 0   ;;  %v485_v34 = vmov 0.0   ;;  %vm207_vm7 = vcmask 1041409  }
  0x15   :  { %61 = vperm.xlu0 %427, %v38_v1   ;;  %58 = vperm.xlu1 %428, %v37_v2   ;;  %v183_v7 = vld [vmem:[#allocation3 + $0x8] sm:$0xff]  ;;  %v184_v8 = vld [vmem:[#allocation3 + $0x10] sm:$0xff]  ;;  %v185_v10 = vld [vmem:[#allocation3 + $0x18] sm:$0xff]  ;;  %v56_v37 = vand.u32 127, %v55_v36  ;;  %vm210_vm10 = vcmask 1042434   ;;  %vm213_vm11 = vcmask 1043459  }
  0x16   :  { %395 = vmatprep.subr.bf16.mxu0 %v483_v5  ;;  %v396_v9 = vpack.c.bf16 %v183_v7, %v182_v6  ;;  %v41_v11 = vld [vmem:[%s569_s0 + $0x20] sm:$0xff]  ;;  %v42_v12 = vld [vmem:[%s569_s0 + $0x28] sm:$0xff]  ;;  %v399_v13 = vpack.c.bf16 %v185_v10, %v184_v8  ;;  %v43_v14 = vld [vmem:[%s569_s0 + $0x30] sm:$0xff]  ;;  %392 = vmatprep.mubr.msk.f32.mxu0 %vm484_vm0, %v485_v34  ;;  %vm216_vm12 = vcmask 1044484   ;;  %vm219_vm13 = vcmask 1045509   ;;  %s486_s20 = smov [#allocation6]  }
  0x17   :  { %v44_v15 = vld [vmem:[%s569_s0 + $0x38] sm:$0xff]  ;;  %v186_v16 = vld [vmem:[#allocation3 + $0x20] sm:$0xff]  ;;  %v187_v17 = vld [vmem:[#allocation3 + $0x28] sm:$0xff]  ;;  %vm222_vm14 = vcmask 1046534   ;;  %vm225_vm15 = vcmask 1047559   ;;  %s325_s21 = sshll.u32 %s486_s20, 4  ;;  %s326_s21 = int_to_ptr.vmem [resolvable:$true] %s325_s21 }
  0x18   :  { %397 = vmatpush3.bf16.msra.mxu0 %v396_v9  ;;  %v402_v18 = vpack.c.bf16 %v187_v17, %v186_v16  ;;  %v153_v19 = vld [vmem:[%s570_s1] sm:$0xff]  ;;  %v188_v20 = vld [vmem:[#allocation3 + $0x30] sm:$0xff]  ;;  %v189_v21 = vld [vmem:[#allocation3 + $0x38] sm:$0xff]  ;;  %s453_s22 = scalar_lea.vmem %s326_s21, 128  ;;  %p458_p9 = scmp.lt.s32.totalorder %s326_s21, %s326_s21 }
  0x19   :  { %64 = vperm.xlu0 %427, %v39_v3   ;;  %67 = vperm.xlu1 %428, %v40_v4   ;;  %v405_v22 = vpack.c.bf16 %v189_v21, %v188_v20  ;;  %v190_v23 = vld [vmem:[#allocation3 + $0x40] sm:$0xff]  ;;  %v191_v24 = vld [vmem:[#allocation3 + $0x48] sm:$0xff]  ;;  %v192_v26 = vld [vmem:[#allocation3 + $0x50] sm:$0xff]  ;;  %p454_p8 = scmp.ne.s32.totalorder %s326_s21, %s453_s22  ;;  %p459_p10 = scmp.lt.s32.totalorder %s453_s22, %s453_s22 }
  0x1a   :  { %398 = vmatprep.subr.bf16.mxu0 %v483_v5  ;;  %v408_v25 = vpack.c.bf16 %v191_v24, %v190_v23  ;;  %v193_v27 = vld [vmem:[#allocation3 + $0x58] sm:$0xff]  ;;  %v194_v29 = vld [vmem:[#allocation3 + $0x60] sm:$0xff]  ;;  %v195_v30 = vld [vmem:[#allocation3 + $0x68] sm:$0xff] }
  0x1b   :  { %v411_v28 = vpack.c.bf16 %v193_v27, %v192_v26  ;;  %v414_v31 = vpack.c.bf16 %v195_v30, %v194_v29  ;;  %v196_v32 = vld [vmem:[#allocation3 + $0x70] sm:$0xff]  ;;  %v197_v33 = vld [vmem:[#allocation3 + $0x78] sm:$0xff]  ;;  %p460_p11 = por %p459_p10, %p458_p9 }
  0x1c   :  { %400 = vmatpush3.bf16.msra.mxu0 %v399_v13  ;;  %v417_v35 = vpack.c.bf16 %v197_v33, %v196_v32 }
  0x1d   :  { %70 = vperm.xlu0 %427, %v41_v11   ;;  %73 = vperm.xlu1 %428, %v42_v12   ;;  %p461_p12 = pnand %p460_p11, %p454_p8 }
  0x1e   :  { %401 = vmatprep.subr.bf16.mxu0 %v483_v5 }
  0x20   :  { %403 = vmatpush3.bf16.msra.mxu0 %v402_v18 }
  0x21   :  { %76 = vperm.xlu0 %427, %v43_v14   ;;  %79 = vperm.xlu1 %428, %v44_v15  }
  0x22   :  { %404 = vmatprep.subr.bf16.mxu0 %v483_v5 }
  0x24   :  { %406 = vmatpush3.bf16.msra.mxu0 %v405_v22 }
  0x25   :  { %156 = vperm.xlu0 %427, %v153_v19   ;;  %407 = vmatprep.subr.bf16.mxu0 %v483_v5 }
  0x28   :  { %409 = vmatpush3.bf16.msra.mxu0 %v408_v25 }
  0x29   :  { %410 = vmatprep.subr.bf16.mxu0 %v483_v5 }
  0x2c   :  { %412 = vmatpush3.bf16.msra.mxu0 %v411_v28 }
  0x2d   :  { %413 = vmatprep.subr.bf16.mxu0 %v483_v5 }
  0x30   :  { %415 = vmatpush3.bf16.msra.mxu0 %v414_v31 }
  0x31   :  { %416 = vmatprep.subr.bf16.mxu0 %v483_v5 }
  0x34   :  { %418 = vmatpush3.bf16.msra.mxu0 %v417_v35 }
  0x94   :  { %v62_v38 = vpop.permute.xlu0 %61  ;;  %v59_v39 = vpop.permute.xlu1 %58 }
  0x95   :  { %vm82_vm1 = vcmp.eq.s32.totalorder %v62_v38, %v56_v37  ;;  %vm81_vm2 = vcmp.eq.s32.totalorder %v59_v39, %v56_v37 }
  0x96   :  { %v335_v40 = vsel %vm82_vm1, 1.0, %v485_v34  ;;  %v334_v41 = vsel %vm81_vm2, 1.0, %v485_v34 }
  0x97   :  { %v111_v42 = vrot.slane %v335_v40, 4  ;;  %v105_v43 = vrot.slane %v334_v41, 4 }
  0x98   :  { %v65_v44 = vpop.permute.xlu0 %64  ;;  %v68_v45 = vpop.permute.xlu1 %67 }
  0x99   :  { %v112_v46 = vadd.f32 %v335_v40, %v111_v42  ;;  %v106_v47 = vadd.f32 %v334_v41, %v105_v43  ;;  %vm83_vm3 = vcmp.eq.s32.totalorder %v65_v44, %v56_v37  ;;  %vm84_vm4 = vcmp.eq.s32.totalorder %v68_v45, %v56_v37 }
  0x9a   :  { %v336_v48 = vsel %vm83_vm3, 1.0, %v485_v34  ;;  %v337_v49 = vsel %vm84_vm4, 1.0, %v485_v34 }
  0x9b   :  { %v113_v50 = vrot.slane %v112_v46, 2  ;;  %v107_v51 = vrot.slane %v106_v47, 2  ;;  %v117_v52 = vrot.slane %v336_v48, 4  ;;  %v123_v53 = vrot.slane %v337_v49, 4 }
  0x9c   :  { %v71_v54 = vpop.permute.xlu0 %70  ;;  %v74_v55 = vpop.permute.xlu1 %73 }
  0x9d   :  { %v114_v56 = vadd.f32 %v113_v50, %v112_v46  ;;  %v108_v57 = vadd.f32 %v107_v51, %v106_v47  ;;  %v118_v58 = vadd.f32 %v336_v48, %v117_v52  ;;  %v124_v59 = vadd.f32 %v337_v49, %v123_v53 }
  0x9e   :  { %vm85_vm5 = vcmp.eq.s32.totalorder %v71_v54, %v56_v37  ;;  %vm86_vm6 = vcmp.eq.s32.totalorder %v74_v55, %v56_v37 }
  0x9f   :  { %v115_v60 = vrot.slane %v114_v56, 1  ;;  %v119_v61 = vrot.slane %v118_v58, 2  ;;  %v125_v62 = vrot.slane %v124_v59, 2  ;;  %v338_v63 = vsel %vm85_vm5, 1.0, %v485_v34 }
  0xa0   :  { %v339_v0 = vsel %vm86_vm6, 1.0, %v485_v34  ;;  %v77_v1 = vpop.permute.xlu0 %76  ;;  %v80_v2 = vpop.permute.xlu1 %79  ;;  %v109_v4 = vrot.slane %v108_v57, 1  ;;  %v129_v7 = vrot.slane %v338_v63, 4 }
  0xa1   :  { %v116_v3 = vadd.f32 %v115_v60, %v114_v56  ;;  %v120_v5 = vadd.f32 %v119_v61, %v118_v58  ;;  %v126_v6 = vadd.f32 %v125_v62, %v124_v59  ;;  %v135_v8 = vrot.slane %v339_v0, 4 }
  0xa2   :  { %vm87_vm8 = vcmp.eq.s32.totalorder %v77_v1, %v56_v37  ;;  %vm88_vm9 = vcmp.eq.s32.totalorder %v80_v2, %v56_v37  ;;  %v130_v13 = vadd.f32 %v338_v63, %v129_v7  ;;  %v110_v18 = vadd.f32 %v109_v4, %v108_v57  ;;  %v342_v4 = vld [vmem:[%s572_s3] ss:$0 sm:$0xff] }
  0xa3   :  { %v121_v9 = vrot.slane %v120_v5, 1  ;;  %v127_v10 = vrot.slane %v126_v6, 1  ;;  %v340_v11 = vsel %vm87_vm8, 1.0, %v485_v34  ;;  %v341_v12 = vsel %vm88_vm9, 1.0, %v485_v34 }
  0xa4   :  { %v136_v14 = vadd.f32 %v339_v0, %v135_v8  ;;  %v141_v15 = vrot.slane %v340_v11, 4  ;;  %v147_v16 = vrot.slane %v341_v12, 4  ;;  %v157_v17 = vpop.permute.xlu0 %156  ;;  %v131_v22 = vrot.slane %v130_v13, 2 }
  0xa5   :  { %v122_v19 = vadd.f32 %v121_v9, %v120_v5  ;;  %v158_v20 = vrot.slane %v157_v17, 1  ;;  %v159_v21 = vrot.slane %v157_v17, 2  ;;  %v128_v26 = vadd.f32 %v127_v10, %v126_v6 }
  0xa6   :  { %v137_v23 = vrot.slane %v136_v14, 2  ;;  %v142_v24 = vadd.f32 %v340_v11, %v141_v15  ;;  %v148_v25 = vadd.f32 %v341_v12, %v147_v16  ;;  %v160_v27 = vrot.slane %v157_v17, 3 }
  0xa7   :  { %v174_v28 = vmul.f32 %v158_v20, %v116_v3  ;;  %v175_v29 = vmul.f32 %v159_v21, %v122_v19  ;;  %v132_v30 = vadd.f32 %v131_v22, %v130_v13  ;;  %v173_v34 = vmul.f32 %v157_v17, %v110_v18 }
  0xa8   :  { %v138_v31 = vadd.f32 %v137_v23, %v136_v14  ;;  %v143_v32 = vrot.slane %v142_v24, 2  ;;  %v149_v33 = vrot.slane %v148_v25, 2  ;;  %v161_v36 = vrot.slane %v157_v17, 4 }
  0xa9   :  { %v206_v35 = vrot.slane %v174_v28, 7  ;;  %v133_v37 = vrot.slane %v132_v30, 1  ;;  %v162_v41 = vrot.slane %v157_v17, 5  ;;  %v176_v42 = vmul.f32 %v160_v27, %v128_v26 }
  0xaa   :  { %v139_v38 = vrot.slane %v138_v31, 1  ;;  %v144_v39 = vadd.f32 %v143_v32, %v142_v24  ;;  %v150_v40 = vadd.f32 %v149_v33, %v148_v25  ;;  %v209_v44 = vrot.slane %v175_v29, 6 }
  0xab   :  { %v208_v43 = vsel %vm207_vm7, %v206_v35, %v173_v34  ;;  %v134_v45 = vadd.f32 %v133_v37, %v132_v30  ;;  %v163_v49 = vrot.slane %v157_v17, 6  ;;  %v164_v50 = vrot.slane %v157_v17, 7 }
  0xac   :  { %v140_v46 = vadd.f32 %v139_v38, %v138_v31  ;;  %v145_v47 = vrot.slane %v144_v39, 1  ;;  %v151_v48 = vrot.slane %v150_v40, 1  ;;  %v211_v51 = vsel %vm210_vm10, %v209_v44, %v208_v43 }
  0xad   :  { %v212_v52 = vrot.slane %v176_v42, 5  ;;  %v177_v55 = vmul.f32 %v161_v36, %v134_v45 }
  0xae   :  { %v146_v53 = vadd.f32 %v145_v47, %v144_v39  ;;  %v152_v54 = vadd.f32 %v151_v48, %v150_v40  ;;  %v178_v56 = vmul.f32 %v162_v41, %v140_v46 }
  0xaf   :  { %v214_v57 = vsel %vm213_vm11, %v212_v52, %v211_v51  ;;  %v215_v60 = vrot.slane %v177_v55, 4 }
  0xb0   :  { %v179_v58 = vmul.f32 %v163_v49, %v146_v53  ;;  %v180_v59 = vmul.f32 %v164_v50, %v152_v54  ;;  %v218_v61 = vrot.slane %v178_v56, 3 }
  0xb1   :  { %v217_v62 = vsel %vm216_vm12, %v215_v60, %v214_v57 }
  0xb2   :  { %v221_v63 = vrot.slane %v179_v58, 2  ;;  %v224_v0 = vrot.slane %v180_v59, 1  ;;  %v220_v1 = vsel %vm219_vm13, %v218_v61, %v217_v62 }
  0xb4   :  { %v223_v2 = vsel %vm222_vm14, %v221_v63, %v220_v1 }
  0xb5   :  { %v226_v3 = vsel %vm225_vm15, %v224_v0, %v223_v2 }
  0xb6   :  { %393 = vmatmul.mubr.f32.vlgmr.msra.gmra.mrb[0].mxu0 %v226_v3 }
 0x189   :  { %v294_v5 = vpop.f32.mrb[0].mxu0 }
 0x18a   :  { %v311_v6 = vadd.f32 %v342_v4, %v294_v5  ;;  %v394_v7 = vpop.f32.mrb[1].mxu0 }
 0x18c   :  { %v312_v8 = vmul.f32 %v311_v6, %v311_v6 }
 0x18e   :  { %313 = vadd.xlane.f32.xlu1 %v312_v8 }
 0x21b   :  { %v314_v9 = vpop.xlane.xlu1 %313 }
 0x21c   :  { %v315_v10 = vmax.f32 %v314_v9, 1e-24 }
 0x21e   :  { %429 = vrsqrt.f32 %v315_v10 }
 0x228   :  { %v430_v11 = vpop.eup %429 }
 0x229   :  { %v317_v12 = vmul.f32 %v430_v11, %v311_v6 }
 0x22b   :  { %318 = vst [vmem:[#allocation6] sm:$0xff] %v317_v12 }
 0x22c   :  { %464 = shalt.err (!%p461_p12)
}
 0x22d   :  { %s465_s24 = scalar_lea.hbm %s573_s4, 128 }
 0x22e   :  { %p466_p13 = scmp.ne.s32.totalorder %s573_s4, %s465_s24  ;;  %p469_p0 = scmp.lt.u32.totalorder %s465_s24, %s573_s4 }
 0x230   :  { %p471_p1 = pnand %p469_p0, %p466_p13 }
 0x232   :  { %474 = shalt.err (!%p471_p1)
}
 0x233   :  { %328 = dma.vmem_to_hbm [thread:$0]  %s326_s21, 128, %s573_s4, [#allocation5]  }
 0x234   :  { %477 = dma.done.wait [#allocation5], 128  }
 0x235   :  { %478 = vsyncadd [#allocation5], 4294967168 }
 0x236   :  { %332 = vsyncpa [#allocation4], 1 }
 0x237   :  { %333 = vsyncpa [#allocation5], 1 }

</bundles_post_ra>
